<compile_context>
chip_gen: v7x
topology: tpu7x:2x2x1
jax: 0.10.0
libtpu: 0.0.40
codegen_flags: <defaults>
</compile_context>

<pallas_src>
import jax
import jax.numpy as jnp
from jax.experimental import pallas as pl
from jax.experimental.pallas import tpu as pltpu

EPS = 1e-6


def _round_up(n, m):
    return ((n + m - 1) // m) * m


def _vmem_capacity_bytes():
    try:
        return int(pltpu.get_tpu_info().vmem_capacity_bytes)
    except Exception:
        return 64 * 1024 * 1024  # conservative default (v7x per-TensorCore VMEM)


def sublayer_connection_kernel(x_ref, w_ref, b_ref, o_ref):
    # x block: [TR, D]  (full feature dim — needed for the LN reduction)
    # w block: [D, TN] bf16 (LN affine pre-folded), b block: [1, TN], out block: [TR, TN]
    x = x_ref[...].astype(jnp.float32)
    D = x.shape[-1]
    tn = o_ref.shape[-1]

    # --- LayerNorm, two-pass stats (torch unbiased std; eps inside the sqrt) ---
    mean = jnp.sum(x, axis=-1, keepdims=True) * (1.0 / D)
    xc = x - mean
    var_unb = jnp.sum(xc * xc, axis=-1, keepdims=True) * (1.0 / (D - 1))
    x_z = xc * jax.lax.rsqrt(var_unb + EPS)
    # (a_2 * z + b_2) is folded into w_ref / b_ref by the wrapper.

    # --- sublayer: dense projection on the MXU (bf16 operands, f32 accumulation) ---
    sub = jnp.dot(x_z.astype(jnp.bfloat16), w_ref[...],
                  preferred_element_type=jnp.float32)
    sub = sub + b_ref[...].astype(jnp.float32)

    # --- dropout (inference: identity) + residual on this column tile ---
    # TODO(synk): train-mode dropout mask via pltpu.prng_seed/prng_random_bits.
    if tn == D:
        x_res = x
    else:
        col0 = pl.multiple_of(pl.program_id(1) * tn, 128)
        x_res = x_ref[:, pl.ds(col0, tn)].astype(jnp.float32)
    o_ref[...] = (x_res + sub).astype(o_ref.dtype)


def _choose_tiles(R, D, req_tr, budget):
    """Pick (row tile TR, weight column tile TN) under the VMEM budget."""
    # ---- weight column tile ----
    w_full = D * D * 2  # bf16, single-buffered resident copy
    if D % 128 != 0 or w_full <= budget // 3:
        tn = D                                       # fully VMEM-resident weight
        w_resident = w_full + D * 4                  # + bias row
    else:
        tn = 128
        for cand in (1024, 512, 256):
            if D % cand == 0 and 2 * D * cand * 2 <= budget // 3:
                tn = cand
                break
        w_resident = 2 * (D * tn * 2 + tn * 4)       # double-buffered W + bias column tiles

    # ---- row tile ----
    # double-buffered x / out tiles + in-kernel temporaries
    # (centered / z-scored f32 copies, bf16 cast, f32 matmul accumulator)
    per_row = (2 * D * 4) + (2 * tn * 4) + (2 * D * 4 + D * 2 + tn * 4)
    avail = max(budget - w_resident, per_row * 8)
    tr = min(int(req_tr), avail // per_row, _round_up(R, 8))
    # keep >= ~4 row tiles so megacore sharding / pipelining stay busy
    if R >= 4 * 256:
        tr = min(tr, _round_up(pl.cdiv(R, 4), 256))
    # MXU-friendly alignment: multiples of 256 when large, sublane (8) otherwise
    if tr >= 256:
        tr = (tr // 256) * 256
    tr = _round_up(max(tr, 8), 8)
    return tr, tn


def sublayer_connection(x, w, b, a2, b2, *, tr=1024, vmem_limit_bytes=None):
    """x: [B, S, D]; w: [D, D]; b, a2, b2: [D]. Returns [B, S, D]."""
    B, S, D = x.shape
    R = B * S

    if vmem_limit_bytes is None:
        # generation-aware: ~108 MiB on v5e/v6e (128 MiB VMEM), ~54 MiB on v7x (64 MiB/TC)
        vmem_limit_bytes = int(_vmem_capacity_bytes() * 0.85)
    budget = int(vmem_limit_bytes * 0.75)  # headroom for compiler temporaries

    # Fold the LN affine into the projection (exact in f32):
    #   (a2 * z + b2) @ W + b == z @ (a2[:, None] * W) + (b2 @ W + b)
    w_f32 = w.astype(jnp.float32)
    w_folded = (a2.astype(jnp.float32)[:, None] * w_f32).astype(jnp.bfloat16)
    b_folded = (b2.astype(jnp.float32) @ w_f32 + b.astype(jnp.float32)).reshape(1, D)

    trr, tn = _choose_tiles(R, D, tr, budget)
    ni = pl.cdiv(R, trr)
    nj = pl.cdiv(D, tn)

    x2 = x.reshape(R, D)  # no pad/slice round-trip: Pallas masks the ragged last row block

    cost = pl.CostEstimate(
        flops=int(2 * R * D * D + 8 * R * D),
        transcendentals=int(R),
        bytes_accessed=int(2 * R * D * x.dtype.itemsize + D * D * 2 + D * 4),
    )

    def build(single_buffer_invariants):
        if nj == 1:
            inv_kwargs = (dict(pipeline_mode=pl.Buffered(1))
                          if single_buffer_invariants else {})
            w_spec = pl.BlockSpec((D, D), lambda i, j: (0, 0), **inv_kwargs)
            b_spec = pl.BlockSpec((1, D), lambda i, j: (0, 0), **inv_kwargs)
        else:
            w_spec = pl.BlockSpec((D, tn), lambda i, j: (0, j))
            b_spec = pl.BlockSpec((1, tn), lambda i, j: (0, j))
        return pl.pallas_call(
            sublayer_connection_kernel,
            out_shape=jax.ShapeDtypeStruct((R, D), x.dtype),
            grid_spec=pltpu.PrefetchScalarGridSpec(
                num_scalar_prefetch=0,
                grid=(ni, nj),
                in_specs=[
                    pl.BlockSpec((trr, D), lambda i, j: (i, 0)),  # x: row-tiled, col-invariant
                    w_spec,
                    b_spec,
                ],
                out_specs=pl.BlockSpec((trr, tn), lambda i, j: (i, j)),
            ),
            compiler_params=pltpu.CompilerParams(
                dimension_semantics=("parallel", "arbitrary"),
                vmem_limit_bytes=int(vmem_limit_bytes),
            ),
            cost_estimate=cost,
        )

    try:
        out = build(True)(x2, w_folded, b_folded)
    except Exception:
        # Fallback for Pallas versions without single-buffer pipeline_mode support.
        out = build(False)(x2, w_folded, b_folded)

    return out.reshape(B, S, D)


if __name__ == "__main__":
    # Small but lane-aligned demo shapes (D multiple of 128).
    B, S, D = 2, 8, 128
    key = jax.random.PRNGKey(0)
    kx, kw, kb, ka, kb2 = jax.random.split(key, 5)

    x = jax.random.normal(kx, (B, S, D), dtype=jnp.float32)
    # deterministic "sublayer" (dense) parameters
    w = jax.random.normal(kw, (D, D), dtype=jnp.float32) * 0.05
    b = jax.random.normal(kb, (D,), dtype=jnp.float32) * 0.01
    # LayerNorm parameters (perturbed from ones/zeros so the affine fold is exercised)
    a2 = 1.0 + 0.1 * jax.random.normal(ka, (D,), dtype=jnp.float32)
    b2 = 0.1 * jax.random.normal(kb2, (D,), dtype=jnp.float32)

    # tr=8 -> two row tiles: exercises the tiled/pipelined path even at demo size.
    out = sublayer_connection(x, w, b, a2, b2, tr=8)
    jax.block_until_ready(out)

    # --- references ---
    mean = jnp.mean(x, axis=-1, keepdims=True)
    var_unb = jnp.sum((x - mean) ** 2, axis=-1, keepdims=True) / (D - 1)
    x_z = (x - mean) / jnp.sqrt(var_unb + EPS)

    # (a) reference matching the kernel math (folded affine, bf16 matmul, f32 accumulate)
    w_fold = (a2[:, None] * w).astype(jnp.bfloat16)
    b_fold = b2 @ w + b
    ref_bf16 = x + (
        jnp.dot(x_z.reshape(-1, D).astype(jnp.bfloat16), w_fold,
                preferred_element_type=jnp.float32).reshape(B, S, D) + b_fold)

    # (b) full-f32 module semantics
    normed = a2 * x_z + b2
    ref_f32 = x + (normed @ w + b)

    assert jnp.allclose(out, ref_bf16, atol=2e-3, rtol=2e-3), "mismatch vs bf16-matmul reference"
    assert jnp.allclose(out, ref_f32, atol=5e-2, rtol=5e-2), "mismatch vs f32 module reference"

    print("KERNEL_OK")
</pallas_src>

<mosaic_0001>
module attributes {stable_mosaic.version = 11 : i64} {
  func.func @sublayer_connection_kernel(%arg0: i32, %arg1: i32, %arg2: memref<8x128xf32, #tpu.memory_space<vmem>>, %arg3: memref<128x128xbf16, #tpu.memory_space<vmem>>, %arg4: memref<1x128xf32, #tpu.memory_space<vmem>>, %arg5: memref<8x128xf32, #tpu.memory_space<vmem>>) attributes {dimension_semantics = [#tpu.dimension_semantics<parallel>, #tpu.dimension_semantics<arbitrary>], iteration_bounds = array<i64: 2, 1>, scalar_prefetch = 0 : i64, scratch_operands = 0 : i64, tpu.core_type = #tpu.core_type<tc>, window_params = [{transform_indices = @transform_0, window_bounds = array<i64: 8, 128>}, {pipeline_mode = #tpu.pipeline_mode<synchronous>, transform_indices = @transform_1, window_bounds = array<i64: 128, 128>}, {pipeline_mode = #tpu.pipeline_mode<synchronous>, transform_indices = @transform_2, window_bounds = array<i64: 1, 128>}, {transform_indices = @transform_3, window_bounds = array<i64: 8, 128>}]} {
    %c0 = arith.constant 0 : index
    %c0_0 = arith.constant 0 : index
    %0 = vector.load %arg2[%c0, %c0_0] : memref<8x128xf32, #tpu.memory_space<vmem>>, vector<8x128xf32>
    %cst = arith.constant dense<0.000000e+00> : vector<8xf32>
    %1 = vector.multi_reduction <add>, %0, %cst [1] : vector<8x128xf32> to vector<8xf32>
    %2 = vector.shape_cast %1 : vector<8xf32> to vector<8x1xf32>
    %cst_1 = arith.constant 7.812500e-03 : f32
    %3 = vector.broadcast %cst_1 : f32 to vector<8x1xf32>
    %4 = arith.mulf %2, %3 : vector<8x1xf32>
    %5 = vector.broadcast %4 : vector<8x1xf32> to vector<8x128xf32>
    %6 = arith.subf %0, %5 : vector<8x128xf32>
    %7 = arith.mulf %6, %6 : vector<8x128xf32>
    %cst_2 = arith.constant dense<0.000000e+00> : vector<8xf32>
    %8 = vector.multi_reduction <add>, %7, %cst_2 [1] : vector<8x128xf32> to vector<8xf32>
    %9 = vector.shape_cast %8 : vector<8xf32> to vector<8x1xf32>
    %cst_3 = arith.constant 0.00787401571 : f32
    %10 = vector.broadcast %cst_3 : f32 to vector<8x1xf32>
    %11 = arith.mulf %9, %10 : vector<8x1xf32>
    %cst_4 = arith.constant 9.99999997E-7 : f32
    %12 = vector.broadcast %cst_4 : f32 to vector<8x1xf32>
    %13 = arith.addf %11, %12 : vector<8x1xf32>
    %14 = math.rsqrt %13 : vector<8x1xf32>
    %15 = vector.broadcast %14 : vector<8x1xf32> to vector<8x128xf32>
    %16 = arith.mulf %6, %15 : vector<8x128xf32>
    %17 = arith.truncf %16 : vector<8x128xf32> to vector<8x128xbf16>
    %c0_5 = arith.constant 0 : index
    %c0_6 = arith.constant 0 : index
    %18 = vector.load %arg3[%c0_5, %c0_6] : memref<128x128xbf16, #tpu.memory_space<vmem>>, vector<128x128xbf16>
    %cst_7 = arith.constant dense<0.000000e+00> : vector<8x128xf32>
    %19 = tpu.matmul %17, %18, %cst_7 {dimension_numbers = #tpu.dot_dimension_numbers<[1], [0], [0], [1], [0, 0, 1, 1], [], []>} : vector<8x128xbf16>, vector<128x128xbf16>, vector<8x128xf32> -> vector<8x128xf32>
    %c0_8 = arith.constant 0 : index
    %c0_9 = arith.constant 0 : index
    %20 = vector.load %arg4[%c0_8, %c0_9] : memref<1x128xf32, #tpu.memory_space<vmem>>, vector<1x128xf32>
    %21 = vector.broadcast %20 : vector<1x128xf32> to vector<8x128xf32>
    %22 = arith.addf %19, %21 : vector<8x128xf32>
    %23 = arith.addf %0, %22 : vector<8x128xf32>
    %c0_10 = arith.constant 0 : index
    %c0_11 = arith.constant 0 : index
    %24 = vector.load %arg5[%c0_10, %c0_11] : memref<8x128xf32, #tpu.memory_space<vmem>>, vector<8x128xf32>
    tpu.vector_store %arg5[%c0_10, %c0_11], %23 {strides = array<i32>} : memref<8x128xf32, #tpu.memory_space<vmem>>, vector<8x128xf32>,
    return
  }
  func.func @transform_0(%arg0: i32, %arg1: i32) -> (i32, i32) {
    %c0_i32 = arith.constant 0 : i32
    %c0_i32_0 = arith.constant 0 : i32
    return %arg0, %c0_i32 : i32, i32
  }
  func.func @transform_1(%arg0: i32, %arg1: i32) -> (i32, i32) {
    %c0_i32 = arith.constant 0 : i32
    %c0_i32_0 = arith.constant 0 : i32
    %c0_i32_1 = arith.constant 0 : i32
    return %c0_i32, %c0_i32_0 : i32, i32
  }
  func.func @transform_2(%arg0: i32, %arg1: i32) -> (i32, i32) {
    %c0_i32 = arith.constant 0 : i32
    %c0_i32_0 = arith.constant 0 : i32
    %c0_i32_1 = arith.constant 0 : i32
    return %c0_i32, %c0_i32_0 : i32, i32
  }
  func.func @transform_3(%arg0: i32, %arg1: i32) -> (i32, i32) {
    %c0_i32 = arith.constant 0 : i32
    return %arg0, %arg1 : i32, i32
  }
}

module attributes {stable_mosaic.version = 11 : i64} {
  func.func @sublayer_connection_kernel(%arg0: i32, %arg1: i32, %arg2: memref<8x128xf32, #tpu.memory_space<vmem>>, %arg3: memref<128x128xbf16, #tpu.memory_space<vmem>>, %arg4: memref<1x128xf32, #tpu.memory_space<vmem>>, %arg5: memref<8x128xf32, #tpu.memory_space<vmem>>) attributes {dimension_semantics = [#tpu.dimension_semantics<parallel>, #tpu.dimension_semantics<arbitrary>], iteration_bounds = array<i64: 2, 1>, scalar_prefetch = 0 : i64, scratch_operands = 0 : i64, tpu.core_type = #tpu.core_type<tc>, window_params = [{transform_indices = @transform_0, window_bounds = array<i64: 8, 128>}, {pipeline_mode = #tpu.pipeline_mode<synchronous>, transform_indices = @transform_1, window_bounds = array<i64: 128, 128>}, {pipeline_mode = #tpu.pipeline_mode<synchronous>, transform_indices = @transform_2, window_bounds = array<i64: 1, 128>}, {transform_indices = @transform_3, window_bounds = array<i64: 8, 128>}]} {
    %c0 = arith.constant 0 : index
    %c0_0 = arith.constant 0 : index
    %0 = vector.load %arg2[%c0, %c0_0] : memref<8x128xf32, #tpu.memory_space<vmem>>, vector<8x128xf32>
    %cst = arith.constant dense<0.000000e+00> : vector<8xf32>
    %1 = vector.multi_reduction <add>, %0, %cst [1] : vector<8x128xf32> to vector<8xf32>
    %2 = vector.shape_cast %1 : vector<8xf32> to vector<8x1xf32>
    %cst_1 = arith.constant 7.812500e-03 : f32
    %3 = vector.broadcast %cst_1 : f32 to vector<8x1xf32>
    %4 = arith.mulf %2, %3 : vector<8x1xf32>
    %5 = vector.broadcast %4 : vector<8x1xf32> to vector<8x128xf32>
    %6 = arith.subf %0, %5 : vector<8x128xf32>
    %7 = arith.mulf %6, %6 : vector<8x128xf32>
    %cst_2 = arith.constant dense<0.000000e+00> : vector<8xf32>
    %8 = vector.multi_reduction <add>, %7, %cst_2 [1] : vector<8x128xf32> to vector<8xf32>
    %9 = vector.shape_cast %8 : vector<8xf32> to vector<8x1xf32>
    %cst_3 = arith.constant 0.00787401571 : f32
    %10 = vector.broadcast %cst_3 : f32 to vector<8x1xf32>
    %11 = arith.mulf %9, %10 : vector<8x1xf32>
    %cst_4 = arith.constant 9.99999997E-7 : f32
    %12 = vector.broadcast %cst_4 : f32 to vector<8x1xf32>
    %13 = arith.addf %11, %12 : vector<8x1xf32>
    %14 = math.rsqrt %13 : vector<8x1xf32>
    %15 = vector.broadcast %14 : vector<8x1xf32> to vector<8x128xf32>
    %16 = arith.mulf %6, %15 : vector<8x128xf32>
    %17 = arith.truncf %16 : vector<8x128xf32> to vector<8x128xbf16>
    %c0_5 = arith.constant 0 : index
    %c0_6 = arith.constant 0 : index
    %18 = vector.load %arg3[%c0_5, %c0_6] : memref<128x128xbf16, #tpu.memory_space<vmem>>, vector<128x128xbf16>
    %cst_7 = arith.constant dense<0.000000e+00> : vector<8x128xf32>
    %19 = tpu.matmul %17, %18, %cst_7 {dimension_numbers = #tpu.dot_dimension_numbers<[1], [0], [0], [1], [0, 0, 1, 1], [], []>} : vector<8x128xbf16>, vector<128x128xbf16>, vector<8x128xf32> -> vector<8x128xf32>
    %c0_8 = arith.constant 0 : index
    %c0_9 = arith.constant 0 : index
    %20 = vector.load %arg4[%c0_8, %c0_9] : memref<1x128xf32, #tpu.memory_space<vmem>>, vector<1x128xf32>
    %21 = vector.broadcast %20 : vector<1x128xf32> to vector<8x128xf32>
    %22 = arith.addf %19, %21 : vector<8x128xf32>
    %23 = arith.addf %0, %22 : vector<8x128xf32>
    %c0_10 = arith.constant 0 : index
    %c0_11 = arith.constant 0 : index
    %24 = vector.load %arg5[%c0_10, %c0_11] : memref<8x128xf32, #tpu.memory_space<vmem>>, vector<8x128xf32>
    tpu.vector_store %arg5[%c0_10, %c0_11], %23 {strides = array<i32>} : memref<8x128xf32, #tpu.memory_space<vmem>>, vector<8x128xf32>,
    return
  }
  func.func @transform_0(%arg0: i32, %arg1: i32) -> (i32, i32) {
    %c0_i32 = arith.constant 0 : i32
    %c0_i32_0 = arith.constant 0 : i32
    return %arg0, %c0_i32 : i32, i32
  }
  func.func @transform_1(%arg0: i32, %arg1: i32) -> (i32, i32) {
    %c0_i32 = arith.constant 0 : i32
    %c0_i32_0 = arith.constant 0 : i32
    %c0_i32_1 = arith.constant 0 : i32
    return %c0_i32, %c0_i32_0 : i32, i32
  }
  func.func @transform_2(%arg0: i32, %arg1: i32) -> (i32, i32) {
    %c0_i32 = arith.constant 0 : i32
    %c0_i32_0 = arith.constant 0 : i32
    %c0_i32_1 = arith.constant 0 : i32
    return %c0_i32, %c0_i32_0 : i32, i32
  }
  func.func @transform_3(%arg0: i32, %arg1: i32) -> (i32, i32) {
    %c0_i32 = arith.constant 0 : i32
    return %arg0, %arg1 : i32, i32
  }
}

</mosaic_0001>

<bundles_post_ra>
// kernel: tpu_custom_call.1
= control target key start
LH: loop header
LB: loop body
LE: loop exit
PB: predicated region body
PF: predicated region fallthrough
CT: control target
= control target key end

     0   :  { %8 = vsyncpa [#allocation3], 0  ;;  %s980_s0 = inlined_call_operand.hbm [shape: f32[16,128], index: 0, kind: input, shape index: {}]   ;;  %s981_s1 = inlined_call_operand.hbm [shape: bf16[128,128], index: 1, kind: input, shape index: {}]   ;;  %s982_s2 = inlined_call_operand.vmem [shape: f32[1,128], index: 2, kind: input, shape index: {}]   ;;  %s983_s3 = inlined_call_operand.hbm [shape: f32[16,128], index: 3, kind: output, shape index: {}]  }
   0x1   :  { %10 = vsyncpa [#allocation3 + $0x1], 0 }
   0x2   :  { %11 = vsyncpa [#allocation6], 0 }
   0x3   :  { %12 = vsyncpa [#allocation4], 0 }
   0x4   :  { %14 = vsyncpa [#allocation4 + $0x1], 0  ;;  %s759_s12 = smov 0   ;;  %s761_s13 = smov 0  }
   0x5   :  { %s763_s14 = smov 0   ;;  %s765_s15 = smov 0  }
   0x6   :  { %s767_s16 = smov 0   ;;  %s769_s17 = smov 0  }
   0x7 LB: > { %s446_s18 = sadd.s32 4294967295, %s730_s17   ;;  %s447_s19 = sadd.s32 4294967294, %s730_s17   ;;  %s730_s17 = sphi %s769_s17, %s20_s17   ;;  %s726_s16 = sphi %s767_s16, %s1007_s16   ;;  %s722_s15 = sphi %s765_s15, %s1006_s15   ;;  %s718_s14 = sphi %s763_s14, %s1005_s14   ;;  %s714_s13 = sphi %s761_s13, %s1004_s13   ;;  %s710_s12 = sphi %s759_s12, %s1003_s12  }
   0x8   : > { %p52_p0 = scmp.ne.s32.totalorder %s714_s13, %s710_s12  ;;  %p793_p1 = scmp.eq.s32.totalorder %s446_s18, 0 }
   0x9   : > { %p797_p2 = scmp.eq.s32.totalorder %s446_s18, 1  ;;  %p126_p3 = scmp.eq.s32.totalorder %s447_s19, 1 }
   0xa   : > { %s988_s20 = scalar_select %p793_p1, 1, 0 }
   0xb   : > { %s989_s21 = scalar_select %p797_p2, 1, 0 }
   0xc   : > { %p803_p4 = por %p793_p1, %p52_p0  ;;  %p448_p5 = scmp.ge.s32.totalorder %s730_s17, 1 }
   0xd   : > { %p808_p6 = por %p126_p3, %p52_p0  ;;  %p133_p7 = scmp.lt.s32.totalorder %s730_s17, 3 }
   0xe   : > { %s990_s22 = scalar_select %p803_p4, 1, 0 }
   0xf   : > { %s991_s23 = scalar_select %p808_p6, 1, 0 }
  0x10   : > { %p813_p8 = pnand %p448_p5, %p133_p7  ;;  %s732_s25 = smov [#allocation5]  }
  0x11   : > { %s145_s26 = sshll.u32 %s732_s25, 4  ;;  %s32_s28 = sadd.s32 1, %s726_s16  ;;  %s146_s26 = int_to_ptr.vmem [resolvable:$true] %s145_s26 }
  0x12   : > { %s992_s24 = scalar_select %p813_p8, 1, 0 }
  0x13   : > { %p507_p9 = pneg %p813_p8  ;;  %s586_s4 = scalar_lea.hbm %s981_s1, 1024 }
  0x14   : > { %p587_p12 = scmp.ne.s32.totalorder %s981_s1, %s586_s4  ;;  %p593_p5 = scmp.lt.u32.totalorder %s586_s4, %s981_s1 }
  0x15   : > { %p822_p11 = pnand %p507_p9, %p793_p1 }
  0x17   : > { %p588_p13 = pneg %p822_p11 }
  0x19   : > { %p589_p0 = pnand %p588_p13, %p587_p12 }
  0x1b   : > { %p590_p3 = pneg %p589_p0 }
  0x1d   : > { %p595_p7 = pnand %p593_p5, %p590_p3 }
  0x1f   : > { %598 = shalt.err (!%p595_p7)
}
  0x20   : > { %s599_s9 = scalar_lea.vmem %s146_s26, 1024  ;;  %p607_p1 = scmp.lt.s32.totalorder %s146_s26, %s146_s26 }
  0x21   : > { %p600_p9 = scmp.ne.s32.totalorder %s146_s26, %s599_s9  ;;  %p608_p4 = scmp.lt.s32.totalorder %s599_s9, %s599_s9 }
  0x23   : > { %p602_p10 = pnand %p600_p9, %p588_p13  ;;  %p609_p8 = por %p608_p4, %p607_p1 }
  0x25   : > { %p603_p6 = pneg %p602_p10 }
  0x27   : > { %p610_p2 = pnand %p609_p8, %p603_p6 }
  0x29   : > { %613 = shalt.err (!%p610_p2)
}
  0x2a   : > { %s733_s10 = smov 64   ;;  %s734_s11 = smov 4  }
  0x2b   : > { %510 = dma.hbm_to_vmem [thread:$0]  (!%p822_p11), %s981_s1, 1024, %s146_s26, [#allocation6], %s733_s10, %s733_s10, %s734_s11  }
  0x2c   : > { %p34_p1 = scmp.ge.s32.totalorder %s32_s28, 2  ;;  %s39_s25 = sadd.s32 1, %s718_s14 }
  0x2d   : > { %p46_p2 = scmp.ne.s32.totalorder %s718_s14, %s714_s13  ;;  %p47_p4 = scmp.eq.s32.totalorder %s730_s17, 0 }
  0x2e   : > { %s1009_s28 = smov (%p34_p1, %s32_s28), 0  ;;  %p995_p8 = scmp.ne.s32.totalorder %s989_s21, 0 }
  0x2f   : > { %p849_p6 = por %p47_p4, %p46_p2  ;;  %s36_s27 = ssub.s32 %s726_s16, %s1009_s28 }
  0x30   : > { %p855_p10 = por %p995_p8, %p46_p2  ;;  %p520_p12 = scmp.lt.s32.totalorder %s730_s17, 2 }
  0x31   : > { %p37_p11 = scmp.eq.s32.totalorder %s36_s27, 0  ;;  %s162_s26 = sand.u32 1, %s718_s14  }
  0x32   : > { %s451_s4 = sshll.u32 %s162_s26, 3  ;;  %s452_s6 = sshll.u32 %s726_s16, 7 }
  0x33   : > { %s864_s5 = scalar_select %p37_p11, %s718_s14, %s39_s25  }
  0x34   : > { %s870_s9 = scalar_lea.hbm %s980_s0, %s452_s6  ;;  %s166_s21 = scalar_lea.vmem [#allocation2], %s451_s4 }
  0x35   : > { %s173_s10 = sshll.u32 %s166_s21, 4  ;;  %p876_p13 = pnand %p520_p12, %p849_p6  ;;  %s872_s10 = int_to_ptr.vmem [resolvable:$true] %s173_s10 }
  0x36   : > { %s163_s18 = scalar_lea.sflag [#allocation3], %s162_s26  ;;  %s614_s19 = scalar_lea.hbm %s870_s9, 128 }
  0x37   : > { %p615_p0 = scmp.ne.s32.totalorder %s870_s9, %s614_s19  ;;  %p616_p3 = pneg %p876_p13 }
  0x38   : > { %s619_s4 = scalar_lea.hbm %s980_s0, 256  ;;  %p620_p9 = scmp.lt.u32.totalorder %s870_s9, %s980_s0 }
  0x39   : > { %p617_p5 = pnand %p616_p3, %p615_p0  ;;  %p621_p1 = scmp.lt.u32.totalorder %s619_s4, %s614_s19 }
  0x3a   : > { %p623_p4 = scmp.lt.u32.totalorder %s614_s19, %s870_s9 }
  0x3b   : > { %p618_p7 = pneg %p617_p5  ;;  %p622_p2 = por %p621_p1, %p620_p9 }
  0x3d   : > { %p624_p6 = por %p623_p4, %p622_p2 }
  0x3f   : > { %p625_p8 = pnand %p624_p6, %p618_p7 }
  0x41   : > { %628 = shalt.err (!%p625_p8)
}
  0x42   : > { %s629_s26 = scalar_lea.vmem %s872_s10, 128  ;;  %s735_s7 = smov [#allocation2]  }
  0x43   : > { %p630_p12 = scmp.ne.s32.totalorder %s872_s10, %s629_s26  ;;  %s634_s8 = sshll.u32 %s735_s7, 4  ;;  %s635_s8 = int_to_ptr.vmem [resolvable:$false] %s634_s8 }
  0x44   : > { %s636_s21 = scalar_lea.vmem %s635_s8, 256  ;;  %p637_p5 = scmp.lt.s32.totalorder %s872_s10, %s635_s8 }
  0x45   : > { %p632_p11 = pnand %p630_p12, %p616_p3  ;;  %p638_p9 = scmp.lt.s32.totalorder %s636_s21, %s629_s26 }
  0x47   : > { %p633_p0 = pneg %p632_p11  ;;  %p639_p1 = por %p638_p9, %p637_p5 }
  0x49   : > { %p640_p2 = pnand %p639_p1, %p633_p0 }
  0x4b   : > { %643 = shalt.err (!%p640_p2)
}
  0x4c   : > { %514 = dma.hbm_to_vmem [thread:$0]  (!%p876_p13), %s870_s9, 128, %s872_s10, %s163_s18  }
  0x4d   : > { %p998_p7 = scmp.ne.s32.totalorder %s992_s24, 0 }
  0x4e   : > { %s908_s19 = sand.u32 (!%p998_p7), 1, %s714_s13   ;;  %p999_p3 = scmp.ne.s32.totalorder (!%p998_p7), %s990_s22, 0 }
  0x4f   : > { %182 = sbr.rel (%p998_p7) target bundleno = 630 (0x276), region = 32  ;;  %s454_s25 = sshll.u32 (!%p998_p7), %s908_s19, 3 }
  0x50   : > { %s185_s27 = scalar_lea.sflag (!%p998_p7), [#allocation3], %s908_s19  ;;  %s188_s4 = scalar_lea.vmem (!%p998_p7), [#allocation2], %s454_s25 }
  0x56   : > { %697 = dma.done.wait (%p999_p3), %s185_s27, 128  }
  0x57   : > { %699 = vsyncadd (%p999_p3), %s185_s27, 4294967168  ;;  %p1000_p13 = scmp.ne.s32.totalorder %s988_s20, 0 }
  0x59   : > { %701 = dma.done.wait (%p1000_p13), [#allocation6], 1024  }
  0x5a   : > { %703 = vsyncadd (%p1000_p13), [#allocation6], 4294966272  ;;  %v216_v0 = vld [vmem:[%s188_s4] sm:$0xff]  ;;  %v576_v1 = vld [vmem:[#allocation5] sm:$0xff]   ;;  %v736_v2 = vmov 0.0   ;;  %vm737_vm0 = vmmov 0  }
  0x5b   : > { %217 = vadd.xlane.f32.xlu0 %v216_v0  ;;  %479 = vmatprep.subr.bf16.mxu0 %v736_v2  ;;  %v577_v3 = vld [vmem:[#allocation5 + $0x8] sm:$0xff]   ;;  %v578_v4 = vld [vmem:[#allocation5 + $0x10] sm:$0xff]   ;;  %v579_v9 = vld [vmem:[#allocation5 + $0x18] sm:$0xff]   ;;  %s467_s24 = sshll.u32 %s722_s15, 7  ;;  %s214_s9 = scalar_lea.vmem [#allocation7], %s454_s25 }
  0x5c   : > { %480 = vmatpush3.bf16.msra.mxu0 %v576_v1  ;;  %v580_v10 = vld [vmem:[#allocation5 + $0x20] sm:$0xff]   ;;  %v581_v11 = vld [vmem:[#allocation5 + $0x28] sm:$0xff]   ;;  %495 = vmatprep.mubr.msk.bf16.mxu0 %vm737_vm0, %v736_v2  ;;  %v582_v12 = vld [vmem:[#allocation5 + $0x30] sm:$0xff]   ;;  %s357_s10 = sshll.u32 %s214_s9, 4  ;;  %s931_s29 = scalar_lea.hbm %s983_s3, %s467_s24  ;;  %s933_s10 = int_to_ptr.vmem [resolvable:$true] %s357_s10 }
  0x5d   : > { %481 = vmatprep.subr.bf16.mxu0 %v736_v2  ;;  %v583_v13 = vld [vmem:[#allocation5 + $0x38] sm:$0xff]   ;;  %v457_v20 = vld [vmem:[%s982_s2] ss:$0 sm:$0xff]  ;;  %s343_s15 = scalar_lea.sflag [#allocation4], %s908_s19  ;;  %s644_s6 = scalar_lea.vmem %s933_s10, 128 }
  0x5e   : > { %p645_p4 = scmp.ne.s32.totalorder %s933_s10, %s644_s6  ;;  %s738_s26 = smov [#allocation7]  }
  0x5f   : > { %s648_s7 = sshll.u32 %s738_s26, 4  ;;  %s649_s7 = int_to_ptr.vmem [resolvable:$false] %s648_s7 }
  0x60   : > { %482 = vmatpush3.bf16.msra.mxu0 %v577_v3  ;;  %p646_p6 = pnand %p645_p4, %p855_p10  ;;  %s650_s8 = scalar_lea.vmem %s649_s7, 256 }
  0x61   : > { %483 = vmatprep.subr.bf16.mxu0 %v736_v2  ;;  %p651_p12 = scmp.lt.s32.totalorder %s933_s10, %s649_s7  ;;  %p652_p11 = scmp.lt.s32.totalorder %s650_s8, %s644_s6 }
  0x62   : > { %p647_p8 = pneg %p646_p6 }
  0x63   : > { %p653_p0 = por %p652_p11, %p651_p12 }
  0x64   : > { %484 = vmatpush3.bf16.msra.mxu0 %v578_v4 }
  0x65   : > { %485 = vmatprep.subr.bf16.mxu0 %v736_v2  ;;  %p654_p5 = pnand %p653_p0, %p647_p8 }
  0x68   : > { %486 = vmatpush3.bf16.msra.mxu0 %v579_v9 }
  0x69   : > { %487 = vmatprep.subr.bf16.mxu0 %v736_v2 }
  0x6c   : > { %488 = vmatpush3.bf16.msra.mxu0 %v580_v10 }
  0x6d   : > { %489 = vmatprep.subr.bf16.mxu0 %v736_v2 }
  0x70   : > { %490 = vmatpush3.bf16.msra.mxu0 %v581_v11 }
  0x71   : > { %491 = vmatprep.subr.bf16.mxu0 %v736_v2 }
  0x74   : > { %492 = vmatpush3.bf16.msra.mxu0 %v582_v12 }
  0x75   : > { %493 = vmatprep.subr.bf16.mxu0 %v736_v2 }
  0x78   : > { %494 = vmatpush3.bf16.msra.mxu0 %v583_v13 }
  0xe8   : > { %v218_v5 = vpop.xlane.xlu0 %217 }
  0xe9   : > { %v219_v6 = vmul.f32 0.0078125, %v218_v5 }
  0xeb   : > { %v220_v7 = vsub.f32 %v216_v0, %v219_v6 }
  0xed   : > { %v221_v8 = vmul.f32 %v220_v7, %v220_v7 }
  0xef   : > { %222 = vadd.xlane.f32.xlu0 %v221_v8 }
 0x17c   : > { %v223_v14 = vpop.xlane.xlu0 %222 }
 0x17d   : > { %v224_v15 = vmul.f32 0.007874016, %v223_v14 }
 0x17f   : > { %v225_v16 = vadd.f32 1e-06, %v224_v15 }
 0x181   : > { %584 = vrsqrt.f32 %v225_v16 }
 0x18b   : > { %v585_v17 = vpop.eup %584 }
 0x18c   : > { %v227_v18 = vmul.f32 %v585_v17, %v220_v7 }
 0x18e   : > { %v228_v19 = vpack.c.bf16 %v227_v18, %v227_v18 }
 0x190   : > { %496 = vmatmul.mubr.bf16.vlgmr.msra.gmra.mrb[0].mxu0 %v228_v19 }
 0x263   : > { %v334_v21 = vpop.f32.mrb[0].mxu0 }
 0x264   : > { %v335_v22 = vadd.f32 %v457_v20, %v334_v21  ;;  %v497_v23 = vpop.f32.mrb[1].mxu0 }
 0x265   : > { %v337_v24 = vpop.f32.mrb[2].mxu0 }
 0x266   : > { %v340_v25 = vadd.f32 %v335_v22, %v216_v0  ;;  %v498_v26 = vpop.f32.mrb[3].mxu0 }
 0x268   : > { %341 = vst [vmem:[%s214_s9] sm:$0xff] %v340_v25 }
 0x269   : > { %657 = shalt.err (!%p654_p5)
}
 0x26a   : > { %s658_s21 = scalar_lea.hbm %s931_s29, 128  ;;  %s662_s27 = scalar_lea.hbm %s983_s3, 256 }
 0x26b   : > { %p659_p9 = scmp.ne.s32.totalorder %s931_s29, %s658_s21  ;;  %p663_p7 = scmp.lt.u32.totalorder %s931_s29, %s983_s3 }
 0x26c   : > { %p664_p3 = scmp.lt.u32.totalorder %s662_s27, %s658_s21  ;;  %p666_p4 = scmp.lt.u32.totalorder %s658_s21, %s931_s29 }
 0x26d   : > { %p660_p1 = pnand %p659_p9, %p855_p10 }
 0x26e   : > { %p665_p13 = por %p664_p3, %p663_p7 }
 0x26f   : > { %p661_p2 = pneg %p660_p1 }
 0x270   : > { %p667_p6 = por %p666_p4, %p665_p13 }
 0x272   : > { %p668_p8 = pnand %p667_p6, %p661_p2 }
 0x274   : > { %671 = shalt.err (!%p668_p8)
}
 0x275   : > { %505 = dma.vmem_to_hbm [thread:$0]  (%p855_p10), %s933_s10, 128, %s931_s29, %s343_s15  }
 0x276 PF: > { %s369_s22 = sand.u32 1, %s710_s12   ;;  %p1001_p12 = scmp.ne.s32.totalorder %s991_s23, 0 }
 0x277   : > { %p1002_p11 = scmp.ge.s32.totalorder %s730_s17, 2  ;;  %s370_s24 = scalar_lea.sflag [#allocation4], %s369_s22 }
 0x279   : > { %p516_p0 = pnand %p1002_p11, %p1001_p12 }
 0x27b   : > { %705 = dma.done.wait (!%p516_p0), %s370_s24, 128  }
 0x27c   : > { %707 = vsyncadd (!%p516_p0), %s370_s24, 4294967168  ;;  %s20_s17 = sadd.s32 1, %s730_s17   ;;  %s1003_s12 = smov %s714_s13 }
 0x27d   : > { %p17_p5 = scmp.ge.s32.totalorder %s20_s17, 4   ;;  %s1004_s13 = smov %s718_s14 }
 0x27e   : > { %s1005_s14 = smov %s864_s5  ;;  %s1006_s15 = smov %s726_s16 }
 0x27f   : > { %s1007_s16 = smov %s1009_s28  ;;  %19 = sbr.rel (!%p17_p5) target bundleno = 7 (0x7), region = 81 }
 0x286   :  { %375 = vsyncpa [#allocation3], 1 }
 0x287   :  { %377 = vsyncpa [#allocation3 + $0x1], 1 }
 0x288   :  { %378 = vsyncpa [#allocation6], 1 }
 0x289   :  { %379 = vsyncpa [#allocation4], 1 }
 0x28a   :  { %381 = vsyncpa [#allocation4 + $0x1], 1 }

// kernel: tpu_custom_call.1
= control target key start
LH: loop header
LB: loop body
LE: loop exit
PB: predicated region body
PF: predicated region fallthrough
CT: control target
= control target key end

     0   :  { %8 = vsyncpa [#allocation3], 0  ;;  %s980_s0 = inlined_call_operand.hbm [shape: f32[16,128], index: 0, kind: input, shape index: {}]   ;;  %s981_s1 = inlined_call_operand.hbm [shape: bf16[128,128], index: 1, kind: input, shape index: {}]   ;;  %s982_s2 = inlined_call_operand.vmem [shape: f32[1,128], index: 2, kind: input, shape index: {}]   ;;  %s983_s3 = inlined_call_operand.hbm [shape: f32[16,128], index: 3, kind: output, shape index: {}]  }
   0x1   :  { %10 = vsyncpa [#allocation3 + $0x1], 0 }
   0x2   :  { %11 = vsyncpa [#allocation6], 0 }
   0x3   :  { %12 = vsyncpa [#allocation4], 0 }
   0x4   :  { %14 = vsyncpa [#allocation4 + $0x1], 0  ;;  %s759_s12 = smov 0   ;;  %s761_s13 = smov 0  }
   0x5   :  { %s763_s14 = smov 0   ;;  %s765_s15 = smov 0  }
   0x6   :  { %s767_s16 = smov 0   ;;  %s769_s17 = smov 0  }
   0x7 LB: > { %s446_s18 = sadd.s32 4294967295, %s730_s17   ;;  %s447_s19 = sadd.s32 4294967294, %s730_s17   ;;  %s730_s17 = sphi %s769_s17, %s20_s17   ;;  %s726_s16 = sphi %s767_s16, %s1007_s16   ;;  %s722_s15 = sphi %s765_s15, %s1006_s15   ;;  %s718_s14 = sphi %s763_s14, %s1005_s14   ;;  %s714_s13 = sphi %s761_s13, %s1004_s13   ;;  %s710_s12 = sphi %s759_s12, %s1003_s12  }
   0x8   : > { %p52_p0 = scmp.ne.s32.totalorder %s714_s13, %s710_s12  ;;  %p793_p1 = scmp.eq.s32.totalorder %s446_s18, 0 }
   0x9   : > { %p797_p2 = scmp.eq.s32.totalorder %s446_s18, 1  ;;  %p126_p3 = scmp.eq.s32.totalorder %s447_s19, 1 }
   0xa   : > { %s988_s20 = scalar_select %p793_p1, 1, 0 }
   0xb   : > { %s989_s21 = scalar_select %p797_p2, 1, 0 }
   0xc   : > { %p803_p4 = por %p793_p1, %p52_p0  ;;  %p448_p5 = scmp.ge.s32.totalorder %s730_s17, 1 }
   0xd   : > { %p808_p6 = por %p126_p3, %p52_p0  ;;  %p133_p7 = scmp.lt.s32.totalorder %s730_s17, 3 }
   0xe   : > { %s990_s22 = scalar_select %p803_p4, 1, 0 }
   0xf   : > { %s991_s23 = scalar_select %p808_p6, 1, 0 }
  0x10   : > { %p813_p8 = pnand %p448_p5, %p133_p7  ;;  %s732_s25 = smov [#allocation5]  }
  0x11   : > { %s145_s26 = sshll.u32 %s732_s25, 4  ;;  %s32_s28 = sadd.s32 1, %s726_s16  ;;  %s146_s26 = int_to_ptr.vmem [resolvable:$true] %s145_s26 }
  0x12   : > { %s992_s24 = scalar_select %p813_p8, 1, 0 }
  0x13   : > { %p507_p9 = pneg %p813_p8  ;;  %s586_s4 = scalar_lea.hbm %s981_s1, 1024 }
  0x14   : > { %p587_p12 = scmp.ne.s32.totalorder %s981_s1, %s586_s4  ;;  %p593_p5 = scmp.lt.u32.totalorder %s586_s4, %s981_s1 }
  0x15   : > { %p822_p11 = pnand %p507_p9, %p793_p1 }
  0x17   : > { %p588_p13 = pneg %p822_p11 }
  0x19   : > { %p589_p0 = pnand %p588_p13, %p587_p12 }
  0x1b   : > { %p590_p3 = pneg %p589_p0 }
  0x1d   : > { %p595_p7 = pnand %p593_p5, %p590_p3 }
  0x1f   : > { %598 = shalt.err (!%p595_p7)
}
  0x20   : > { %s599_s9 = scalar_lea.vmem %s146_s26, 1024  ;;  %p607_p1 = scmp.lt.s32.totalorder %s146_s26, %s146_s26 }
  0x21   : > { %p600_p9 = scmp.ne.s32.totalorder %s146_s26, %s599_s9  ;;  %p608_p4 = scmp.lt.s32.totalorder %s599_s9, %s599_s9 }
  0x23   : > { %p602_p10 = pnand %p600_p9, %p588_p13  ;;  %p609_p8 = por %p608_p4, %p607_p1 }
  0x25   : > { %p603_p6 = pneg %p602_p10 }
  0x27   : > { %p610_p2 = pnand %p609_p8, %p603_p6 }
  0x29   : > { %613 = shalt.err (!%p610_p2)
}
  0x2a   : > { %s733_s10 = smov 64   ;;  %s734_s11 = smov 4  }
  0x2b   : > { %510 = dma.hbm_to_vmem [thread:$0]  (!%p822_p11), %s981_s1, 1024, %s146_s26, [#allocation6], %s733_s10, %s733_s10, %s734_s11  }
  0x2c   : > { %p34_p1 = scmp.ge.s32.totalorder %s32_s28, 2  ;;  %s39_s25 = sadd.s32 1, %s718_s14 }
  0x2d   : > { %p46_p2 = scmp.ne.s32.totalorder %s718_s14, %s714_s13  ;;  %p47_p4 = scmp.eq.s32.totalorder %s730_s17, 0 }
  0x2e   : > { %s1009_s28 = smov (%p34_p1, %s32_s28), 0  ;;  %p995_p8 = scmp.ne.s32.totalorder %s989_s21, 0 }
  0x2f   : > { %p849_p6 = por %p47_p4, %p46_p2  ;;  %s36_s27 = ssub.s32 %s726_s16, %s1009_s28 }
  0x30   : > { %p855_p10 = por %p995_p8, %p46_p2  ;;  %p520_p12 = scmp.lt.s32.totalorder %s730_s17, 2 }
  0x31   : > { %p37_p11 = scmp.eq.s32.totalorder %s36_s27, 0  ;;  %s162_s26 = sand.u32 1, %s718_s14  }
  0x32   : > { %s451_s4 = sshll.u32 %s162_s26, 3  ;;  %s452_s6 = sshll.u32 %s726_s16, 7 }
  0x33   : > { %s864_s5 = scalar_select %p37_p11, %s718_s14, %s39_s25  }
  0x34   : > { %s870_s9 = scalar_lea.hbm %s980_s0, %s452_s6  ;;  %s166_s21 = scalar_lea.vmem [#allocation2], %s451_s4 }
  0x35   : > { %s173_s10 = sshll.u32 %s166_s21, 4  ;;  %p876_p13 = pnand %p520_p12, %p849_p6  ;;  %s872_s10 = int_to_ptr.vmem [resolvable:$true] %s173_s10 }
  0x36   : > { %s163_s18 = scalar_lea.sflag [#allocation3], %s162_s26  ;;  %s614_s19 = scalar_lea.hbm %s870_s9, 128 }
  0x37   : > { %p615_p0 = scmp.ne.s32.totalorder %s870_s9, %s614_s19  ;;  %p616_p3 = pneg %p876_p13 }
  0x38   : > { %s619_s4 = scalar_lea.hbm %s980_s0, 256  ;;  %p620_p9 = scmp.lt.u32.totalorder %s870_s9, %s980_s0 }
  0x39   : > { %p617_p5 = pnand %p616_p3, %p615_p0  ;;  %p621_p1 = scmp.lt.u32.totalorder %s619_s4, %s614_s19 }
  0x3a   : > { %p623_p4 = scmp.lt.u32.totalorder %s614_s19, %s870_s9 }
  0x3b   : > { %p618_p7 = pneg %p617_p5  ;;  %p622_p2 = por %p621_p1, %p620_p9 }
  0x3d   : > { %p624_p6 = por %p623_p4, %p622_p2 }
  0x3f   : > { %p625_p8 = pnand %p624_p6, %p618_p7 }
  0x41   : > { %628 = shalt.err (!%p625_p8)
}
  0x42   : > { %s629_s26 = scalar_lea.vmem %s872_s10, 128  ;;  %s735_s7 = smov [#allocation2]  }
  0x43   : > { %p630_p12 = scmp.ne.s32.totalorder %s872_s10, %s629_s26  ;;  %s634_s8 = sshll.u32 %s735_s7, 4  ;;  %s635_s8 = int_to_ptr.vmem [resolvable:$false] %s634_s8 }
  0x44   : > { %s636_s21 = scalar_lea.vmem %s635_s8, 256  ;;  %p637_p5 = scmp.lt.s32.totalorder %s872_s10, %s635_s8 }
  0x45   : > { %p632_p11 = pnand %p630_p12, %p616_p3  ;;  %p638_p9 = scmp.lt.s32.totalorder %s636_s21, %s629_s26 }
  0x47   : > { %p633_p0 = pneg %p632_p11  ;;  %p639_p1 = por %p638_p9, %p637_p5 }
  0x49   : > { %p640_p2 = pnand %p639_p1, %p633_p0 }
  0x4b   : > { %643 = shalt.err (!%p640_p2)
}
  0x4c   : > { %514 = dma.hbm_to_vmem [thread:$0]  (!%p876_p13), %s870_s9, 128, %s872_s10, %s163_s18  }
  0x4d   : > { %p998_p7 = scmp.ne.s32.totalorder %s992_s24, 0 }
  0x4e   : > { %s908_s19 = sand.u32 (!%p998_p7), 1, %s714_s13   ;;  %p999_p3 = scmp.ne.s32.totalorder (!%p998_p7), %s990_s22, 0 }
  0x4f   : > { %182 = sbr.rel (%p998_p7) target bundleno = 630 (0x276), region = 32  ;;  %s454_s25 = sshll.u32 (!%p998_p7), %s908_s19, 3 }
  0x50   : > { %s185_s27 = scalar_lea.sflag (!%p998_p7), [#allocation3], %s908_s19  ;;  %s188_s4 = scalar_lea.vmem (!%p998_p7), [#allocation2], %s454_s25 }
  0x56   : > { %697 = dma.done.wait (%p999_p3), %s185_s27, 128  }
  0x57   : > { %699 = vsyncadd (%p999_p3), %s185_s27, 4294967168  ;;  %p1000_p13 = scmp.ne.s32.totalorder %s988_s20, 0 }
  0x59   : > { %701 = dma.done.wait (%p1000_p13), [#allocation6], 1024  }
  0x5a   : > { %703 = vsyncadd (%p1000_p13), [#allocation6], 4294966272  ;;  %v216_v0 = vld [vmem:[%s188_s4] sm:$0xff]  ;;  %v576_v1 = vld [vmem:[#allocation5] sm:$0xff]   ;;  %v736_v2 = vmov 0.0   ;;  %vm737_vm0 = vmmov 0  }
  0x5b   : > { %217 = vadd.xlane.f32.xlu0 %v216_v0  ;;  %479 = vmatprep.subr.bf16.mxu0 %v736_v2  ;;  %v577_v3 = vld [vmem:[#allocation5 + $0x8] sm:$0xff]   ;;  %v578_v4 = vld [vmem:[#allocation5 + $0x10] sm:$0xff]   ;;  %v579_v9 = vld [vmem:[#allocation5 + $0x18] sm:$0xff]   ;;  %s467_s24 = sshll.u32 %s722_s15, 7  ;;  %s214_s9 = scalar_lea.vmem [#allocation7], %s454_s25 }
  0x5c   : > { %480 = vmatpush3.bf16.msra.mxu0 %v576_v1  ;;  %v580_v10 = vld [vmem:[#allocation5 + $0x20] sm:$0xff]   ;;  %v581_v11 = vld [vmem:[#allocation5 + $0x28] sm:$0xff]   ;;  %495 = vmatprep.mubr.msk.bf16.mxu0 %vm737_vm0, %v736_v2  ;;  %v582_v12 = vld [vmem:[#allocation5 + $0x30] sm:$0xff]   ;;  %s357_s10 = sshll.u32 %s214_s9, 4  ;;  %s931_s29 = scalar_lea.hbm %s983_s3, %s467_s24  ;;  %s933_s10 = int_to_ptr.vmem [resolvable:$true] %s357_s10 }
  0x5d   : > { %481 = vmatprep.subr.bf16.mxu0 %v736_v2  ;;  %v583_v13 = vld [vmem:[#allocation5 + $0x38] sm:$0xff]   ;;  %v457_v20 = vld [vmem:[%s982_s2] ss:$0 sm:$0xff]  ;;  %s343_s15 = scalar_lea.sflag [#allocation4], %s908_s19  ;;  %s644_s6 = scalar_lea.vmem %s933_s10, 128 }
  0x5e   : > { %p645_p4 = scmp.ne.s32.totalorder %s933_s10, %s644_s6  ;;  %s738_s26 = smov [#allocation7]  }
  0x5f   : > { %s648_s7 = sshll.u32 %s738_s26, 4  ;;  %s649_s7 = int_to_ptr.vmem [resolvable:$false] %s648_s7 }
  0x60   : > { %482 = vmatpush3.bf16.msra.mxu0 %v577_v3  ;;  %p646_p6 = pnand %p645_p4, %p855_p10  ;;  %s650_s8 = scalar_lea.vmem %s649_s7, 256 }
  0x61   : > { %483 = vmatprep.subr.bf16.mxu0 %v736_v2  ;;  %p651_p12 = scmp.lt.s32.totalorder %s933_s10, %s649_s7  ;;  %p652_p11 = scmp.lt.s32.totalorder %s650_s8, %s644_s6 }
  0x62   : > { %p647_p8 = pneg %p646_p6 }
  0x63   : > { %p653_p0 = por %p652_p11, %p651_p12 }
  0x64   : > { %484 = vmatpush3.bf16.msra.mxu0 %v578_v4 }
  0x65   : > { %485 = vmatprep.subr.bf16.mxu0 %v736_v2  ;;  %p654_p5 = pnand %p653_p0, %p647_p8 }
  0x68   : > { %486 = vmatpush3.bf16.msra.mxu0 %v579_v9 }
  0x69   : > { %487 = vmatprep.subr.bf16.mxu0 %v736_v2 }
  0x6c   : > { %488 = vmatpush3.bf16.msra.mxu0 %v580_v10 }
  0x6d   : > { %489 = vmatprep.subr.bf16.mxu0 %v736_v2 }
  0x70   : > { %490 = vmatpush3.bf16.msra.mxu0 %v581_v11 }
  0x71   : > { %491 = vmatprep.subr.bf16.mxu0 %v736_v2 }
  0x74   : > { %492 = vmatpush3.bf16.msra.mxu0 %v582_v12 }
  0x75   : > { %493 = vmatprep.subr.bf16.mxu0 %v736_v2 }
  0x78   : > { %494 = vmatpush3.bf16.msra.mxu0 %v583_v13 }
  0xe8   : > { %v218_v5 = vpop.xlane.xlu0 %217 }
  0xe9   : > { %v219_v6 = vmul.f32 0.0078125, %v218_v5 }
  0xeb   : > { %v220_v7 = vsub.f32 %v216_v0, %v219_v6 }
  0xed   : > { %v221_v8 = vmul.f32 %v220_v7, %v220_v7 }
  0xef   : > { %222 = vadd.xlane.f32.xlu0 %v221_v8 }
 0x17c   : > { %v223_v14 = vpop.xlane.xlu0 %222 }
 0x17d   : > { %v224_v15 = vmul.f32 0.007874016, %v223_v14 }
 0x17f   : > { %v225_v16 = vadd.f32 1e-06, %v224_v15 }
 0x181   : > { %584 = vrsqrt.f32 %v225_v16 }
 0x18b   : > { %v585_v17 = vpop.eup %584 }
 0x18c   : > { %v227_v18 = vmul.f32 %v585_v17, %v220_v7 }
 0x18e   : > { %v228_v19 = vpack.c.bf16 %v227_v18, %v227_v18 }
 0x190   : > { %496 = vmatmul.mubr.bf16.vlgmr.msra.gmra.mrb[0].mxu0 %v228_v19 }
 0x263   : > { %v334_v21 = vpop.f32.mrb[0].mxu0 }
 0x264   : > { %v335_v22 = vadd.f32 %v457_v20, %v334_v21  ;;  %v497_v23 = vpop.f32.mrb[1].mxu0 }
 0x265   : > { %v337_v24 = vpop.f32.mrb[2].mxu0 }
 0x266   : > { %v340_v25 = vadd.f32 %v335_v22, %v216_v0  ;;  %v498_v26 = vpop.f32.mrb[3].mxu0 }
 0x268   : > { %341 = vst [vmem:[%s214_s9] sm:$0xff] %v340_v25 }
 0x269   : > { %657 = shalt.err (!%p654_p5)
}
 0x26a   : > { %s658_s21 = scalar_lea.hbm %s931_s29, 128  ;;  %s662_s27 = scalar_lea.hbm %s983_s3, 256 }
 0x26b   : > { %p659_p9 = scmp.ne.s32.totalorder %s931_s29, %s658_s21  ;;  %p663_p7 = scmp.lt.u32.totalorder %s931_s29, %s983_s3 }
 0x26c   : > { %p664_p3 = scmp.lt.u32.totalorder %s662_s27, %s658_s21  ;;  %p666_p4 = scmp.lt.u32.totalorder %s658_s21, %s931_s29 }
 0x26d   : > { %p660_p1 = pnand %p659_p9, %p855_p10 }
 0x26e   : > { %p665_p13 = por %p664_p3, %p663_p7 }
 0x26f   : > { %p661_p2 = pneg %p660_p1 }
 0x270   : > { %p667_p6 = por %p666_p4, %p665_p13 }
 0x272   : > { %p668_p8 = pnand %p667_p6, %p661_p2 }
 0x274   : > { %671 = shalt.err (!%p668_p8)
}
 0x275   : > { %505 = dma.vmem_to_hbm [thread:$0]  (%p855_p10), %s933_s10, 128, %s931_s29, %s343_s15  }
 0x276 PF: > { %s369_s22 = sand.u32 1, %s710_s12   ;;  %p1001_p12 = scmp.ne.s32.totalorder %s991_s23, 0 }
 0x277   : > { %p1002_p11 = scmp.ge.s32.totalorder %s730_s17, 2  ;;  %s370_s24 = scalar_lea.sflag [#allocation4], %s369_s22 }
 0x279   : > { %p516_p0 = pnand %p1002_p11, %p1001_p12 }
 0x27b   : > { %705 = dma.done.wait (!%p516_p0), %s370_s24, 128  }
 0x27c   : > { %707 = vsyncadd (!%p516_p0), %s370_s24, 4294967168  ;;  %s20_s17 = sadd.s32 1, %s730_s17   ;;  %s1003_s12 = smov %s714_s13 }
 0x27d   : > { %p17_p5 = scmp.ge.s32.totalorder %s20_s17, 4   ;;  %s1004_s13 = smov %s718_s14 }
 0x27e   : > { %s1005_s14 = smov %s864_s5  ;;  %s1006_s15 = smov %s726_s16 }
 0x27f   : > { %s1007_s16 = smov %s1009_s28  ;;  %19 = sbr.rel (!%p17_p5) target bundleno = 7 (0x7), region = 81 }
 0x286   :  { %375 = vsyncpa [#allocation3], 1 }
 0x287   :  { %377 = vsyncpa [#allocation3 + $0x1], 1 }
 0x288   :  { %378 = vsyncpa [#allocation6], 1 }
 0x289   :  { %379 = vsyncpa [#allocation4], 1 }
 0x28a   :  { %381 = vsyncpa [#allocation4 + $0x1], 1 }

</bundles_post_ra>
